<compile_context>
chip_gen: v5e
topology: v5e:2x2
jax: 0.10.0
libtpu: 0.0.40
codegen_flags: <defaults>
</compile_context>

<pallas_src>
import functools

import jax
import jax.numpy as jnp
from jax.experimental import pallas as pl
from jax.experimental.pallas import tpu as pltpu

_SENT_FAKE = -1e4   # stable softplus(x)  == 0 exactly at this sentinel
_SENT_REAL = 1e4    # stable softplus(-x) == 0 exactly at this sentinel


def _disc_loss_kernel(fake_ref, real_ref, out_ref, *,
                      block_rows, blocks_per_core,
                      rows_f, rows_r, scale_f, scale_r, fuse_log):
    c = pl.program_id(0)      # TensorCore (parallel) axis
    i = pl.program_id(1)      # streaming / reduction (arbitrary) axis

    @pl.when(i == 0)
    def _():
        out_ref[...] = jnp.zeros_like(out_ref)

    # Global (unclamped) row index of every element in this tile.
    row0 = (c * blocks_per_core + i) * block_rows
    row_ids = row0 + jax.lax.broadcasted_iota(jnp.int32, (block_rows, 128), 0)

    f_raw = fake_ref[...].astype(jnp.float32)
    r_raw = real_ref[...].astype(jnp.float32)
    # Mask invalid rows (partial last block, clamped / out-of-range blocks) by
    # replacing the INPUT with a zero-contribution sentinel.  jnp.where is a
    # select, so NaN/Inf garbage in out-of-bounds rows cannot poison the sum.
    f = jnp.where(row_ids < rows_f, f_raw, _SENT_FAKE)
    r = jnp.where(row_ids < rows_r, r_raw, _SENT_REAL)

    if fuse_log:
        # n_fake == n_real:  softplus(f) + softplus(-r)
        #   = relu(f) + relu(-r) + log((1 + e^-|f|) * (1 + e^-|r|))
        # -> 2 exp + 1 log per element pair (25% off the EUP bottleneck).
        a = jnp.exp(-jnp.abs(f))
        b = jnp.exp(-jnp.abs(r))
        contrib = (jnp.maximum(f, 0.0) + jnp.maximum(-r, 0.0)
                   + jnp.log((1.0 + a) * (1.0 + b))) * scale_f
    else:
        # Separate stable softplus forms (needed when the two means differ).
        fake_elt = jnp.maximum(f, 0.0) + jnp.log1p(jnp.exp(-jnp.abs(f)))
        real_elt = jnp.maximum(r, 0.0) - r + jnp.log1p(jnp.exp(-jnp.abs(r)))
        contrib = fake_elt * scale_f + real_elt * scale_r

    # Fold (block_rows, 128) -> (8, 128) with pure VPU adds and accumulate
    # straight into the resident output block (no scratch, no per-step XLU).
    out_ref[...] += jnp.sum(contrib.reshape(block_rows // 8, 8, 128), axis=0)


def _round_up(x, m):
    return ((x + m - 1) // m) * m


def _lane_slab(x, sentinel):
    """Lane-dense (rows, 128) view of x.  Free (bitcast reshape) when the
    element count is a multiple of 128; otherwise a minimal <128-element pad."""
    flat = jnp.ravel(x)
    n = flat.size
    rows = max(pl.cdiv(n, 128), 1)
    rem = rows * 128 - n
    if rem:
        flat = jnp.concatenate([flat, jnp.full((rem,), sentinel, flat.dtype)])
    return flat.reshape(rows, 128)


def _row_pad(slab, min_rows, sentinel):
    """Pad rows with sentinels only if the slab is shorter than one block."""
    rows = slab.shape[0]
    if rows >= min_rows:
        return slab
    pad = jnp.full((min_rows - rows, 128), sentinel, slab.dtype)
    return jnp.concatenate([slab, pad], axis=0)


def discriminator_loss(fake_pred, real_pred, *, max_block_rows=1024):
    n_fake = int(fake_pred.size)
    n_real = int(real_pred.size)

    itemsize = max(jnp.dtype(fake_pred.dtype).itemsize,
                   jnp.dtype(real_pred.dtype).itemsize)
    row_align = 16 if itemsize <= 2 else 8   # sublane granularity

    fake2d = _lane_slab(fake_pred, _SENT_FAKE)
    real2d = _lane_slab(real_pred, _SENT_REAL)
    rows_total = max(fake2d.shape[0], real2d.shape[0])

    # Large, aligned tiles: 1024 rows = 0.5 MiB/input/buffer -> ~2 MiB VMEM
    # with double buffering; amortizes the ~0.35us per-grid-step overhead.
    block_rows = max(row_align,
                     min(_round_up(max_block_rows, row_align),
                         (rows_total // row_align) * row_align))

    # Only inputs smaller than a single block ever get row-padded (tiny copy).
    fake2d = _row_pad(fake2d, block_rows, _SENT_FAKE)
    real2d = _row_pad(real2d, block_rows, _SENT_REAL)
    rows_f, rows_r = fake2d.shape[0], real2d.shape[0]

    blocks_total = pl.cdiv(max(rows_f, rows_r), block_rows)
    n_cores = 2 if blocks_total > 1 else 1        # both TensorCores on v7x
    blocks_per_core = pl.cdiv(blocks_total, n_cores)

    nb_f = pl.cdiv(rows_f, block_rows)
    nb_r = pl.cdiv(rows_r, block_rows)

    # Clamp fully-out-of-range block indices to each input's last block; the
    # kernel's row mask zeroes their contribution.
    def fake_map(c, i):
        return (jnp.minimum(c * blocks_per_core + i, nb_f - 1), 0)

    def real_map(c, i):
        return (jnp.minimum(c * blocks_per_core + i, nb_r - 1), 0)

    kernel = functools.partial(
        _disc_loss_kernel,
        block_rows=block_rows, blocks_per_core=blocks_per_core,
        rows_f=rows_f, rows_r=rows_r,
        scale_f=0.5 / float(n_fake), scale_r=0.5 / float(n_real),
        fuse_log=(n_fake == n_real))

    total = n_fake + n_real
    cost = pl.CostEstimate(
        flops=12 * total,
        transcendentals=2 * total,
        bytes_accessed=itemsize * total + 4 * 8 * 128 * n_cores)

    partial = pl.pallas_call(
        kernel,
        out_shape=jax.ShapeDtypeStruct((n_cores, 8, 128), jnp.float32),
        grid=(n_cores, blocks_per_core),
        in_specs=[
            pl.BlockSpec((block_rows, 128), fake_map),
            pl.BlockSpec((block_rows, 128), real_map),
        ],
        out_specs=pl.BlockSpec((None, 8, 128), lambda c, i: (c, 0, 0)),
        compiler_params=pltpu.CompilerParams(
            dimension_semantics=("parallel", "arbitrary")),
        cost_estimate=cost,
    )(fake2d, real2d)

    # Tiny cross-core / cross-lane finish in plain XLA (at most 2x8x128 f32).
    return jnp.sum(partial)


def _reference(fake_pred, real_pred):
    # Pure-JAX reference (same math as torch.nn.BCEWithLogitsLoss, mean).
    f = fake_pred.astype(jnp.float32)
    r = real_pred.astype(jnp.float32)
    fake_loss = jnp.mean(jnp.maximum(f, 0.0) + jnp.log1p(jnp.exp(-jnp.abs(f))))
    real_loss = jnp.mean(jnp.maximum(r, 0.0) - r + jnp.log1p(jnp.exp(-jnp.abs(r))))
    return (fake_loss + real_loss) * 0.5


if __name__ == "__main__":
    key = jax.random.PRNGKey(0)
    k1, k2, k3, k4, k5, k6 = jax.random.split(key, 6)

    # Typical PatchGAN discriminator logits: NCHW, small test shape.
    fake_pred = jax.random.normal(k1, (2, 4, 16, 16), dtype=jnp.float32)
    real_pred = jax.random.normal(k2, (2, 4, 16, 16), dtype=jnp.float32) + 0.5

    loss = jax.jit(discriminator_loss)(fake_pred, real_pred)
    jax.block_until_ready(loss)
    ref = _reference(fake_pred, real_pred)
    assert jnp.allclose(loss, ref, rtol=1e-5, atol=1e-5), (loss, ref)

    # Non-128-multiple element count + multi-block, dual-core grid.
    fp2 = jax.random.normal(k3, (3, 1, 30, 37), dtype=jnp.float32)
    rp2 = jax.random.normal(k4, (3, 1, 30, 37), dtype=jnp.float32) - 0.25
    loss2 = discriminator_loss(fp2, rp2, max_block_rows=8)
    jax.block_until_ready(loss2)
    ref2 = _reference(fp2, rp2)
    assert jnp.allclose(loss2, ref2, rtol=1e-5, atol=1e-5), (loss2, ref2)

    # Unequal input sizes: exercises the non-fused path, per-input row counts,
    # index clamping and in-kernel masking.
    fp3 = jax.random.normal(k5, (2, 1, 16, 16), dtype=jnp.float32)
    rp3 = jax.random.normal(k6, (2, 1, 24, 24), dtype=jnp.float32) + 1.0
    loss3 = discriminator_loss(fp3, rp3)
    jax.block_until_ready(loss3)
    ref3 = _reference(fp3, rp3)
    assert jnp.allclose(loss3, ref3, rtol=1e-5, atol=1e-5), (loss3, ref3)

    print("KERNEL_OK")
</pallas_src>

<mosaic_0001>
module attributes {stable_mosaic.version = 11 : i64} {
  func.func @_disc_loss_kernel(%arg0: i32, %arg1: i32, %arg2: memref<16x128xf32, #tpu.memory_space<vmem>>, %arg3: memref<16x128xf32, #tpu.memory_space<vmem>>, %arg4: memref<1x8x128xf32, #tpu.memory_space<vmem>>) attributes {dimension_semantics = [#tpu.dimension_semantics<parallel>, #tpu.dimension_semantics<arbitrary>], iteration_bounds = array<i64: 1, 1>, scalar_prefetch = 0 : i64, scratch_operands = 0 : i64, tpu.core_type = #tpu.core_type<tc>, window_params = [{transform_indices = @transform_0, window_bounds = array<i64: 16, 128>}, {transform_indices = @transform_1, window_bounds = array<i64: 16, 128>}, {transform_indices = @transform_2, window_bounds = array<i64: 1, 8, 128>}]} {
    %c0_i32 = arith.constant 0 : i32
    %0 = arith.cmpi eq, %arg1, %c0_i32 : i32
    %1 = arith.extui %0 : i1 to i32
    %c0_i32_0 = arith.constant 0 : i32
    %2 = arith.cmpi ne, %1, %c0_i32_0 : i32
    scf.if %2 {
      %cst_22 = arith.constant 0.000000e+00 : f32
      %51 = vector.broadcast %cst_22 : f32 to vector<8x128xf32>
      %c0_23 = arith.constant 0 : index
      %c0_24 = arith.constant 0 : index
      %c0_25 = arith.constant 0 : index
      %52 = vector.load %arg4[%c0_23, %c0_24, %c0_25] : memref<1x8x128xf32, #tpu.memory_space<vmem>>, vector<1x8x128xf32>
      %53 = vector.shape_cast %52 : vector<1x8x128xf32> to vector<8x128xf32>
      %54 = vector.shape_cast %51 : vector<8x128xf32> to vector<1x8x128xf32>
      tpu.vector_store %arg4[%c0_23, %c0_24, %c0_25], %54 {strides = array<i32>} : memref<1x8x128xf32, #tpu.memory_space<vmem>>, vector<1x8x128xf32>,
    } else {
    }
    %c1_i32 = arith.constant 1 : i32
    %3 = arith.muli %arg0, %c1_i32 : i32
    %4 = arith.addi %3, %arg1 : i32
    %c16_i32 = arith.constant 16 : i32
    %5 = arith.muli %4, %c16_i32 : i32
    %6 = tpu.iota {dimensions = array<i32: 0>} : vector<16x128xi32>
    %7 = vector.broadcast %5 : i32 to vector<16x128xi32>
    %8 = arith.addi %7, %6 : vector<16x128xi32>
    %c0 = arith.constant 0 : index
    %c0_1 = arith.constant 0 : index
    %9 = vector.load %arg2[%c0, %c0_1] : memref<16x128xf32, #tpu.memory_space<vmem>>, vector<16x128xf32>
    %c0_2 = arith.constant 0 : index
    %c0_3 = arith.constant 0 : index
    %10 = vector.load %arg3[%c0_2, %c0_3] : memref<16x128xf32, #tpu.memory_space<vmem>>, vector<16x128xf32>
    %c16_i32_4 = arith.constant 16 : i32
    %11 = vector.broadcast %c16_i32_4 : i32 to vector<16x128xi32>
    %12 = arith.cmpi slt, %8, %11 : vector<16x128xi32>
    %cst = arith.constant -1.000000e+04 : f32
    %13 = vector.broadcast %cst : f32 to vector<16x128xf32>
    %14 = arith.select %12, %9, %13 : vector<16x128xi1>, vector<16x128xf32>
    %c16_i32_5 = arith.constant 16 : i32
    %15 = vector.broadcast %c16_i32_5 : i32 to vector<16x128xi32>
    %16 = arith.cmpi slt, %8, %15 : vector<16x128xi32>
    %cst_6 = arith.constant 1.000000e+04 : f32
    %17 = vector.broadcast %cst_6 : f32 to vector<16x128xf32>
    %18 = arith.select %16, %10, %17 : vector<16x128xi1>, vector<16x128xf32>
    %19 = math.absf %14 : vector<16x128xf32>
    %cst_7 = arith.constant 0.000000e+00 : f32
    %20 = vector.broadcast %cst_7 : f32 to vector<16x128xf32>
    %21 = arith.subf %20, %19 : vector<16x128xf32>
    %22 = math.exp %21 : vector<16x128xf32>
    %23 = math.absf %18 : vector<16x128xf32>
    %cst_8 = arith.constant 0.000000e+00 : f32
    %24 = vector.broadcast %cst_8 : f32 to vector<16x128xf32>
    %25 = arith.subf %24, %23 : vector<16x128xf32>
    %26 = math.exp %25 : vector<16x128xf32>
    %cst_9 = arith.constant 0.000000e+00 : f32
    %27 = vector.broadcast %cst_9 : f32 to vector<16x128xf32>
    %28 = arith.maximumf %14, %27 : vector<16x128xf32>
    %cst_10 = arith.constant 0.000000e+00 : f32
    %29 = vector.broadcast %cst_10 : f32 to vector<16x128xf32>
    %30 = arith.subf %29, %18 : vector<16x128xf32>
    %cst_11 = arith.constant 0.000000e+00 : f32
    %31 = vector.broadcast %cst_11 : f32 to vector<16x128xf32>
    %32 = arith.maximumf %30, %31 : vector<16x128xf32>
    %33 = arith.addf %28, %32 : vector<16x128xf32>
    %cst_12 = arith.constant 1.000000e+00 : f32
    %34 = vector.broadcast %cst_12 : f32 to vector<16x128xf32>
    %35 = arith.addf %34, %22 : vector<16x128xf32>
    %cst_13 = arith.constant 1.000000e+00 : f32
    %36 = vector.broadcast %cst_13 : f32 to vector<16x128xf32>
    %37 = arith.addf %36, %26 : vector<16x128xf32>
    %38 = arith.mulf %35, %37 : vector<16x128xf32>
    %39 = math.log %38 : vector<16x128xf32>
    %40 = arith.addf %33, %39 : vector<16x128xf32>
    %cst_14 = arith.constant 2.44140625E-4 : f32
    %41 = vector.broadcast %cst_14 : f32 to vector<16x128xf32>
    %42 = arith.mulf %40, %41 : vector<16x128xf32>
    %c0_15 = arith.constant 0 : index
    %c0_16 = arith.constant 0 : index
    %c0_17 = arith.constant 0 : index
    %43 = vector.load %arg4[%c0_15, %c0_16, %c0_17] : memref<1x8x128xf32, #tpu.memory_space<vmem>>, vector<1x8x128xf32>
    %44 = vector.shape_cast %43 : vector<1x8x128xf32> to vector<8x128xf32>
    %45 = vector.shape_cast %42 : vector<16x128xf32> to vector<2x8x128xf32>
    %cst_18 = arith.constant dense<0.000000e+00> : vector<8x128xf32>
    %46 = vector.multi_reduction <add>, %45, %cst_18 [0] : vector<2x8x128xf32> to vector<8x128xf32>
    %47 = arith.addf %44, %46 : vector<8x128xf32>
    %c0_19 = arith.constant 0 : index
    %c0_20 = arith.constant 0 : index
    %c0_21 = arith.constant 0 : index
    %48 = vector.load %arg4[%c0_19, %c0_20, %c0_21] : memref<1x8x128xf32, #tpu.memory_space<vmem>>, vector<1x8x128xf32>
    %49 = vector.shape_cast %48 : vector<1x8x128xf32> to vector<8x128xf32>
    %50 = vector.shape_cast %47 : vector<8x128xf32> to vector<1x8x128xf32>
    tpu.vector_store %arg4[%c0_19, %c0_20, %c0_21], %50 {strides = array<i32>} : memref<1x8x128xf32, #tpu.memory_space<vmem>>, vector<1x8x128xf32>,
    return
  }
  func.func @transform_0(%arg0: i32, %arg1: i32) -> (i32, i32) {
    %c1_i32 = arith.constant 1 : i32
    %0 = arith.muli %arg0, %c1_i32 : i32
    %1 = arith.addi %0, %arg1 : i32
    %c0_i32 = arith.constant 0 : i32
    %2 = arith.minsi %1, %c0_i32 : i32
    %c0_i32_0 = arith.constant 0 : i32
    %c0_i32_1 = arith.constant 0 : i32
    return %2, %c0_i32_0 : i32, i32
  }
  func.func @transform_1(%arg0: i32, %arg1: i32) -> (i32, i32) {
    %c1_i32 = arith.constant 1 : i32
    %0 = arith.muli %arg0, %c1_i32 : i32
    %1 = arith.addi %0, %arg1 : i32
    %c0_i32 = arith.constant 0 : i32
    %2 = arith.minsi %1, %c0_i32 : i32
    %c0_i32_0 = arith.constant 0 : i32
    %c0_i32_1 = arith.constant 0 : i32
    return %2, %c0_i32_0 : i32, i32
  }
  func.func @transform_2(%arg0: i32, %arg1: i32) -> (i32, i32, i32) {
    %c0_i32 = arith.constant 0 : i32
    %c0_i32_0 = arith.constant 0 : i32
    %c0_i32_1 = arith.constant 0 : i32
    return %arg0, %c0_i32, %c0_i32_0 : i32, i32, i32
  }
}

</mosaic_0001>

<bundles_post_ra>
// kernel: discriminator_loss.1
= control target key start
LH: loop header
LB: loop body
LE: loop exit
PB: predicated region body
PF: predicated region fallthrough
CT: control target
= control target key end

     0   :  { %s199_s0 = inlined_call_operand.vmem [shape: f32[16,128], index: 0, kind: input, shape index: {}]   ;;  %s200_s1 = inlined_call_operand.vmem [shape: f32[16,128], index: 1, kind: input, shape index: {}]   ;;  %s201_s2 = inlined_call_operand.vmem [shape: f32[1,8,128], index: 2, kind: output, shape index: {}]  }
   0x1   :  { %v88_v0 = vld [vmem:[%s199_s0] sm:$0xff]  ;;  %v89_v1 = vld [vmem:[%s199_s0 + $0x8] sm:$0xff] }
   0x2   :  { %v90_v2 = vld [vmem:[%s200_s1] sm:$0xff]  ;;  %v91_v3 = vld [vmem:[%s200_s1 + $0x8] sm:$0xff]  ;;  %v98_v4 = vand.u32 2147483647, %v88_v0  ;;  %v99_v5 = vand.u32 2147483647, %v89_v1 }
   0x3   :  { %v106_v6 = vand.u32 2147483647, %v90_v2  ;;  %v107_v7 = vand.u32 2147483647, %v91_v3  ;;  %v116_v23 = vsub.f32 0.0, %v90_v2  ;;  %v117_v25 = vsub.f32 0.0, %v91_v3 }
   0x4   :  { %v100_v8 = vsub.f32 0.0, %v98_v4  ;;  %v101_v9 = vsub.f32 0.0, %v99_v5  ;;  %v114_v28 = vmax.f32 %v88_v0, 0.0  ;;  %v115_v30 = vmax.f32 %v89_v1, 0.0 }
   0x5   :  { %v108_v10 = vsub.f32 0.0, %v106_v6  ;;  %v109_v11 = vsub.f32 0.0, %v107_v7  ;;  %v118_v29 = vmax.f32 %v116_v23, 0.0  ;;  %v119_v31 = vmax.f32 %v117_v25, 0.0 }
   0x6   :  { %v102_v12 = vmul.f32 1.442695, %v100_v8  ;;  %v104_v13 = vmul.f32 1.442695, %v101_v9 }
   0x7   :  { %v110_v14 = vmul.f32 1.442695, %v108_v10  ;;  %v112_v15 = vmul.f32 1.442695, %v109_v11  ;;  %v120_v32 = vadd.f32 %v118_v29, %v114_v28  ;;  %v121_v34 = vadd.f32 %v119_v31, %v115_v30 }
   0x8   :  { %157 = vpow2.f32 %v102_v12 }
   0x9   :  { %159 = vpow2.f32 %v104_v13 }
   0xa   :  { %161 = vpow2.f32 %v110_v14 }
   0xb   :  { %163 = vpow2.f32 %v112_v15 }
   0xe   :  { %v158_v16 = vpop.eup %157 }
   0xf   :  { %v160_v17 = vpop.eup %159  ;;  %v122_v18 = vadd.f32 1.0, %v158_v16 }
  0x10   :  { %v162_v19 = vpop.eup %161  ;;  %v123_v20 = vadd.f32 1.0, %v160_v17 }
  0x11   :  { %v164_v21 = vpop.eup %163  ;;  %v124_v22 = vadd.f32 1.0, %v162_v19 }
  0x12   :  { %v125_v24 = vadd.f32 1.0, %v164_v21 }
  0x13   :  { %v126_v26 = vmul.f32 %v124_v22, %v122_v18 }
  0x14   :  { %v127_v27 = vmul.f32 %v125_v24, %v123_v20 }
  0x15   :  { %165 = vlog2.f32 %v126_v26 }
  0x16   :  { %167 = vlog2.f32 %v127_v27 }
  0x1b   :  { %v166_v33 = vpop.eup %165 }
  0x1c   :  { %v168_v35 = vpop.eup %167  ;;  %v129_v36 = vmul.f32 0.6931472, %v166_v33 }
  0x1d   :  { %v131_v37 = vmul.f32 0.6931472, %v168_v35 }
  0x1e   :  { %v132_v38 = vadd.f32 %v129_v36, %v120_v32 }
  0x1f   :  { %v133_v39 = vadd.f32 %v131_v37, %v121_v34 }
  0x20   :  { %v134_v40 = vmul.f32 0.00024414063, %v132_v38 }
  0x21   :  { %v135_v41 = vmul.f32 0.00024414063, %v133_v39 }
  0x23   :  { %v137_v42 = vadd.f32 %v135_v41, %v134_v40 }
  0x25   :  { %139 = vst [vmem:[%s201_s2] sm:$0xff] %v137_v42 }

</bundles_post_ra>
